<compile_context>
chip_gen: v5e
topology: v5e:2x2
jax: 0.10.0
libtpu: 0.0.40
codegen_flags: <defaults>
</compile_context>

<pallas_src>
import functools

import jax
import jax.numpy as jnp
from jax.experimental import pallas as pl
from jax.experimental.pallas import tpu as pltpu


def _round_up(n, m):
    return ((n + m - 1) // m) * m


def _rbm_to_hidden_kernel(seed_ref, x_ref, w_ref, hb_ref, prob_ref, samp_ref):
    """One batch tile of to_hidden: sigmoid(x @ W + h_bias), then Bernoulli sample."""
    tb, hp = prob_ref.shape

    # MXU matmul with f32 accumulation (inputs are bf16).
    h = jnp.dot(x_ref[...], w_ref[...], preferred_element_type=jnp.float32)
    prob = jax.nn.sigmoid(h + hb_ref[...])               # (TB, Hp) + (1, Hp) broadcast
    prob_ref[...] = prob.astype(prob_ref.dtype)

    # Stateless counter-based PRNG (splitmix32-style finalizer).  The counter is
    # the GLOBAL element index (tile offset via program_id), so each grid step
    # draws an independent stream.  Pure jnp integer ops -> lowers on TPU and
    # also works in interpret mode (unlike pltpu.prng_*).
    row = jax.lax.broadcasted_iota(jnp.int32, (tb, hp), 0) + pl.program_id(0) * tb
    col = jax.lax.broadcasted_iota(jnp.int32, (tb, hp), 1)
    ctr = (row * hp + col).astype(jnp.uint32)
    seed = seed_ref[0].astype(jnp.uint32)
    z = ctr + seed * jnp.uint32(0x9E3779B9)
    z = (z ^ (z >> 16)) * jnp.uint32(0x7FEB352D)
    z = (z ^ (z >> 15)) * jnp.uint32(0x846CA68B)
    z = z ^ (z >> 16)
    # Top 24 bits -> uniform in [0, 1); sample = 1 with probability `prob`.
    # (Probabilities below 2^-24 can never fire -- acceptable vs torch.bernoulli.)
    u = (z >> 8).astype(jnp.float32) * jnp.float32(1.0 / (1 << 24))
    samp_ref[...] = (u < prob).astype(samp_ref.dtype)


@functools.partial(jax.jit, static_argnames=("block_b", "compute_dtype"))
def rbm_forward(x, weight, h_bias, seed, *, block_b=512, compute_dtype=jnp.bfloat16):
    """Pallas implementation of RBM.forward (== to_hidden).

    x:      (B, V) float
    weight: (V, H) float
    h_bias: (H,)   float
    seed:   (1,)   int32 (Bernoulli sampling seed)
    returns (hid_prob, hid_sample), each (B, H) float32
    """
    B, V = x.shape
    H = weight.shape[1]

    # Lane-pad hidden/visible dims to 128; tile the batch into the grid.
    Hp = _round_up(H, 128)
    Vp = _round_up(V, 128)
    TB = min(block_b, _round_up(B, 8))
    Bp = _round_up(B, TB)

    x_p = jnp.zeros((Bp, Vp), compute_dtype).at[:B, :V].set(x.astype(compute_dtype))
    w_p = jnp.zeros((Vp, Hp), compute_dtype).at[:V, :H].set(weight.astype(compute_dtype))
    hb_p = jnp.zeros((1, Hp), jnp.float32).at[0, :H].set(h_bias.astype(jnp.float32))

    grid_spec = pltpu.PrefetchScalarGridSpec(
        num_scalar_prefetch=1,                                # seed -> SMEM
        grid=(Bp // TB,),
        in_specs=[
            pl.BlockSpec((TB, Vp), lambda i, seed: (i, 0)),   # x: batch tile
            pl.BlockSpec((Vp, Hp), lambda i, seed: (0, 0)),   # W: VMEM-resident
            pl.BlockSpec((1, Hp), lambda i, seed: (0, 0)),    # h_bias: VMEM-resident
        ],
        out_specs=[
            pl.BlockSpec((TB, Hp), lambda i, seed: (i, 0)),   # hid_prob tile
            pl.BlockSpec((TB, Hp), lambda i, seed: (i, 0)),   # hid_sample tile
        ],
    )

    prob, sample = pl.pallas_call(
        _rbm_to_hidden_kernel,
        out_shape=(
            jax.ShapeDtypeStruct((Bp, Hp), jnp.float32),
            jax.ShapeDtypeStruct((Bp, Hp), jnp.float32),
        ),
        grid_spec=grid_spec,
        compiler_params=pltpu.CompilerParams(
            dimension_semantics=("parallel",),                # independent batch tiles
            vmem_limit_bytes=32 * 1024 * 1024,                # safe on v5e/v6e/v7x
        ),
    )(seed, x_p, w_p, hb_p)

    return prob[:B, :H], sample[:B, :H]


def init_rbm_params(key, visible_units=256, hidden_units=64):
    """Deterministic init matching the PyTorch module:
    weight: xavier_uniform_ with sigmoid gain (=1.0); v_bias, h_bias: zeros."""
    gain = 1.0  # nn.init.calculate_gain('sigmoid') == 1.0
    limit = gain * jnp.sqrt(6.0 / (visible_units + hidden_units))
    weight = jax.random.uniform(
        key, (visible_units, hidden_units), jnp.float32, -limit, limit
    )
    v_bias = jnp.zeros((visible_units,), jnp.float32)
    h_bias = jnp.zeros((hidden_units,), jnp.float32)
    return weight, v_bias, h_bias


if __name__ == "__main__":
    visible_units = 256
    hidden_units = 64
    batch = 16

    root = jax.random.PRNGKey(0)
    k_w, k_x = jax.random.split(root)

    weight, v_bias, h_bias = init_rbm_params(k_w, visible_units, hidden_units)
    x = jax.random.uniform(k_x, (batch, visible_units), jnp.float32)
    seed = jnp.array([1234], dtype=jnp.int32)

    hid_prob, hid_sample = rbm_forward(x, weight, h_bias, seed)
    jax.block_until_ready((hid_prob, hid_sample))

    # Sanity checks against a pure-JAX f32 reference for the deterministic part.
    # (atol loosened slightly because the kernel feeds bf16 inputs to the MXU.)
    ref_prob = jax.nn.sigmoid(x @ weight + h_bias)
    assert hid_prob.shape == (batch, hidden_units)
    assert hid_sample.shape == (batch, hidden_units)
    assert jnp.allclose(hid_prob, ref_prob, atol=3e-2), "hid_prob mismatch"
    assert bool(jnp.all((hid_sample == 0.0) | (hid_sample == 1.0))), "sample not binary"

    print("KERNEL_OK")
</pallas_src>

<mosaic_0001>
module attributes {stable_mosaic.version = 11 : i64} {
  func.func @_rbm_to_hidden_kernel(%arg0: i32, %arg1: memref<1xi32, #tpu.memory_space<smem>>, %arg2: memref<16x256xbf16, #tpu.memory_space<vmem>>, %arg3: memref<256x128xbf16, #tpu.memory_space<vmem>>, %arg4: memref<1x128xf32, #tpu.memory_space<vmem>>, %arg5: memref<16x128xf32, #tpu.memory_space<vmem>>, %arg6: memref<16x128xf32, #tpu.memory_space<vmem>>) attributes {dimension_semantics = [#tpu.dimension_semantics<parallel>], iteration_bounds = array<i64: 1>, scalar_prefetch = 1 : i64, scratch_operands = 0 : i64, tpu.core_type = #tpu.core_type<tc>, window_params = [{transform_indices = @transform_0, window_bounds = array<i64: 16, 256>}, {pipeline_mode = #tpu.pipeline_mode<synchronous>, transform_indices = @transform_1, window_bounds = array<i64: 256, 128>}, {pipeline_mode = #tpu.pipeline_mode<synchronous>, transform_indices = @transform_2, window_bounds = array<i64: 1, 128>}, {transform_indices = @transform_3, window_bounds = array<i64: 16, 128>}, {transform_indices = @transform_4, window_bounds = array<i64: 16, 128>}]} {
    %c0 = arith.constant 0 : index
    %c0_0 = arith.constant 0 : index
    %0 = vector.load %arg2[%c0, %c0_0] : memref<16x256xbf16, #tpu.memory_space<vmem>>, vector<16x256xbf16>
    %c0_1 = arith.constant 0 : index
    %c0_2 = arith.constant 0 : index
    %1 = vector.load %arg3[%c0_1, %c0_2] : memref<256x128xbf16, #tpu.memory_space<vmem>>, vector<256x128xbf16>
    %cst = arith.constant dense<0.000000e+00> : vector<16x128xf32>
    %2 = tpu.matmul %0, %1, %cst {dimension_numbers = #tpu.dot_dimension_numbers<[1], [0], [0], [1], [0, 0, 1, 1], [], []>} : vector<16x256xbf16>, vector<256x128xbf16>, vector<16x128xf32> -> vector<16x128xf32>
    %c0_3 = arith.constant 0 : index
    %c0_4 = arith.constant 0 : index
    %3 = vector.load %arg4[%c0_3, %c0_4] : memref<1x128xf32, #tpu.memory_space<vmem>>, vector<1x128xf32>
    %4 = vector.broadcast %3 : vector<1x128xf32> to vector<16x128xf32>
    %5 = arith.addf %2, %4 : vector<16x128xf32>
    %6 = arith.negf %5 : vector<16x128xf32>
    %7 = math.exp %6 : vector<16x128xf32>
    %cst_5 = arith.constant 1.000000e+00 : f32
    %8 = vector.broadcast %cst_5 : f32 to vector<16x128xf32>
    %9 = arith.addf %8, %7 : vector<16x128xf32>
    %10 = arith.divf %8, %9 : vector<16x128xf32>
    %c0_6 = arith.constant 0 : index
    %c0_7 = arith.constant 0 : index
    %11 = vector.load %arg5[%c0_6, %c0_7] : memref<16x128xf32, #tpu.memory_space<vmem>>, vector<16x128xf32>
    tpu.vector_store %arg5[%c0_6, %c0_7], %10 {strides = array<i32>} : memref<16x128xf32, #tpu.memory_space<vmem>>, vector<16x128xf32>,
    %12 = tpu.iota {dimensions = array<i32: 0>} : vector<16x128xi32>
    %c16_i32 = arith.constant 16 : i32
    %13 = arith.muli %arg0, %c16_i32 : i32
    %14 = vector.broadcast %13 : i32 to vector<16x128xi32>
    %15 = arith.addi %12, %14 : vector<16x128xi32>
    %16 = tpu.iota {dimensions = array<i32: 1>} : vector<16x128xi32>
    %c128_i32 = arith.constant 128 : i32
    %17 = vector.broadcast %c128_i32 : i32 to vector<16x128xi32>
    %18 = arith.muli %15, %17 : vector<16x128xi32>
    %19 = arith.addi %18, %16 : vector<16x128xi32>
    %c0_8 = arith.constant 0 : index
    %20 = memref.load %arg1[%c0_8] : memref<1xi32, #tpu.memory_space<smem>>
    %c-1640531527_i32 = arith.constant -1640531527 : i32
    %21 = arith.muli %20, %c-1640531527_i32 : i32
    %22 = vector.broadcast %21 : i32 to vector<16x128xi32>
    %23 = arith.addi %19, %22 : vector<16x128xi32>
    %c16_i32_9 = arith.constant 16 : i32
    %24 = vector.broadcast %c16_i32_9 : i32 to vector<16x128xi32>
    %25 = arith.shrui %23, %24 : vector<16x128xi32>
    %26 = arith.xori %23, %25 : vector<16x128xi32>
    %c2146121005_i32 = arith.constant 2146121005 : i32
    %27 = vector.broadcast %c2146121005_i32 : i32 to vector<16x128xi32>
    %28 = arith.muli %26, %27 : vector<16x128xi32>
    %c15_i32 = arith.constant 15 : i32
    %29 = vector.broadcast %c15_i32 : i32 to vector<16x128xi32>
    %30 = arith.shrui %28, %29 : vector<16x128xi32>
    %31 = arith.xori %28, %30 : vector<16x128xi32>
    %c-2073254261_i32 = arith.constant -2073254261 : i32
    %32 = vector.broadcast %c-2073254261_i32 : i32 to vector<16x128xi32>
    %33 = arith.muli %31, %32 : vector<16x128xi32>
    %c16_i32_10 = arith.constant 16 : i32
    %34 = vector.broadcast %c16_i32_10 : i32 to vector<16x128xi32>
    %35 = arith.shrui %33, %34 : vector<16x128xi32>
    %36 = arith.xori %33, %35 : vector<16x128xi32>
    %c8_i32 = arith.constant 8 : i32
    %37 = vector.broadcast %c8_i32 : i32 to vector<16x128xi32>
    %38 = arith.shrui %36, %37 : vector<16x128xi32>
    %39 = arith.uitofp %38 : vector<16x128xi32> to vector<16x128xf32>
    %cst_11 = arith.constant 5.96046448E-8 : f32
    %40 = vector.broadcast %cst_11 : f32 to vector<16x128xf32>
    %41 = arith.mulf %39, %40 : vector<16x128xf32>
    %42 = arith.cmpf olt, %41, %10 : vector<16x128xf32>
    %43 = arith.extui %42 : vector<16x128xi1> to vector<16x128xi32>
    %44 = arith.sitofp %43 : vector<16x128xi32> to vector<16x128xf32>
    %c0_12 = arith.constant 0 : index
    %c0_13 = arith.constant 0 : index
    %45 = vector.load %arg6[%c0_12, %c0_13] : memref<16x128xf32, #tpu.memory_space<vmem>>, vector<16x128xf32>
    tpu.vector_store %arg6[%c0_12, %c0_13], %44 {strides = array<i32>} : memref<16x128xf32, #tpu.memory_space<vmem>>, vector<16x128xf32>,
    return
  }
  func.func @transform_0(%arg0: i32, %arg1: memref<1xi32, #tpu.memory_space<smem>>) -> (i32, i32) {
    %c0_i32 = arith.constant 0 : i32
    %c0_i32_0 = arith.constant 0 : i32
    return %arg0, %c0_i32 : i32, i32
  }
  func.func @transform_1(%arg0: i32, %arg1: memref<1xi32, #tpu.memory_space<smem>>) -> (i32, i32) {
    %c0_i32 = arith.constant 0 : i32
    %c0_i32_0 = arith.constant 0 : i32
    %c0_i32_1 = arith.constant 0 : i32
    return %c0_i32, %c0_i32_0 : i32, i32
  }
  func.func @transform_2(%arg0: i32, %arg1: memref<1xi32, #tpu.memory_space<smem>>) -> (i32, i32) {
    %c0_i32 = arith.constant 0 : i32
    %c0_i32_0 = arith.constant 0 : i32
    %c0_i32_1 = arith.constant 0 : i32
    return %c0_i32, %c0_i32_0 : i32, i32
  }
  func.func @transform_3(%arg0: i32, %arg1: memref<1xi32, #tpu.memory_space<smem>>) -> (i32, i32) {
    %c0_i32 = arith.constant 0 : i32
    %c0_i32_0 = arith.constant 0 : i32
    return %arg0, %c0_i32 : i32, i32
  }
  func.func @transform_4(%arg0: i32, %arg1: memref<1xi32, #tpu.memory_space<smem>>) -> (i32, i32) {
    %c0_i32 = arith.constant 0 : i32
    %c0_i32_0 = arith.constant 0 : i32
    return %arg0, %c0_i32 : i32, i32
  }
}

</mosaic_0001>

<bundles_post_ra>
// kernel: rbm_forward.1
= control target key start
LH: loop header
LB: loop body
LE: loop exit
PB: predicated region body
PF: predicated region fallthrough
CT: control target
= control target key end

     0   :  { %12 = vsyncpa [#allocation5], 0  ;;  %s596_s0 = inlined_call_operand.<no memory space> [shape: s32[1], index: 0, kind: input, shape index: {}]   ;;  %s597_s1 = inlined_call_operand.vmem [shape: bf16[16,256], index: 1, kind: input, shape index: {}]   ;;  %s598_s2 = inlined_call_operand.vmem [shape: bf16[256,128], index: 2, kind: input, shape index: {}]   ;;  %s599_s3 = inlined_call_operand.vmem [shape: f32[1,128], index: 3, kind: input, shape index: {}]   ;;  %s600_s4 = inlined_call_operand.hbm [shape: f32[16,128], index: 4, kind: output, shape index: {0}]   ;;  %s601_s5 = inlined_call_operand.hbm [shape: f32[16,128], index: 5, kind: output, shape index: {1}]  }
   0x1   :  { %v411_v0 = vld [vmem:[%s598_s2 + $0x38] sm:$0xff]  ;;  %v410_v2 = vld [vmem:[%s598_s2 + $0x30] sm:$0xff]  ;;  %v409_v4 = vld [vmem:[%s598_s2 + $0x28] sm:$0xff] }
   0x2   :  { %v419_v1 = vld [vmem:[%s598_s2 + $0x78] sm:$0xff]  ;;  %164 = vmatpush.bf16.msra.mxu0 %v411_v0  ;;  %v418_v3 = vld [vmem:[%s598_s2 + $0x70] sm:$0xff]  ;;  %v417_v5 = vld [vmem:[%s598_s2 + $0x68] sm:$0xff] }
   0x3   :  { %178 = vmatpush.bf16.msra.mxu1 %v419_v1 }
   0x6   :  { %165 = vmatpush.bf16.msra.mxu0 %v410_v2 }
   0x7   :  { %179 = vmatpush.bf16.msra.mxu1 %v418_v3 }
   0x8   :  { %13 = vsyncpa [#allocation7], 0  ;;  %v408_v6 = vld [vmem:[%s598_s2 + $0x20] sm:$0xff]  ;;  %v407_v8 = vld [vmem:[%s598_s2 + $0x18] sm:$0xff]  ;;  %v232_v22 = vlaneseq  ;;  %s246_s9 = smul.u32 2654435769, %s596_s0 }
   0x9   :  { %v416_v7 = vld [vmem:[%s598_s2 + $0x60] sm:$0xff]  ;;  %v415_v9 = vld [vmem:[%s598_s2 + $0x58] sm:$0xff]  ;;  %v406_v10 = vld [vmem:[%s598_s2 + $0x10] sm:$0xff]  ;;  %s296_s13 = sshll.u32 %s600_s4, 4  ;;  %s488_s14 = smov [#allocation6]   ;;  %s297_s13 = int_to_ptr.hbm [resolvable:$true] %s296_s13 }
   0xa   :  { %166 = vmatpush.bf16.msra.mxu0 %v409_v4  ;;  %v414_v11 = vld [vmem:[%s598_s2 + $0x50] sm:$0xff]  ;;  %v405_v12 = vld [vmem:[%s598_s2 + $0x8] sm:$0xff]  ;;  %v404_v14 = vld [vmem:[%s598_s2] sm:$0xff]  ;;  %v233_v23 = vshrl.u32 %v232_v22, 7  ;;  %v240_v24 = vand.u32 127, %v232_v22  ;;  %v247_v27 = vstv %s246_s9  ;;  %s307_s15 = sshll.u32 %s488_s14, 4  ;;  %s308_s15 = int_to_ptr.vmem [resolvable:$true] %s307_s15 }
   0xb   :  { %180 = vmatpush.bf16.msra.mxu1 %v417_v5  ;;  %v413_v13 = vld [vmem:[%s598_s2 + $0x48] sm:$0xff]  ;;  %v412_v15 = vld [vmem:[%s598_s2 + $0x40] sm:$0xff]  ;;  %s309_s18 = sshll.u32 %s601_s5, 4  ;;  %s489_s4 = smov 128   ;;  %s310_s18 = int_to_ptr.hbm [resolvable:$true] %s309_s18 }
   0xc   :  { %v328_v16 = vld [vmem:[%s597_s1] sm:$0xf]  ;;  %v403_v17 = vld [vmem:[%s597_s1 + $0x4] sm:$0xf0]  ;;  %v402_v18 = vld [vmem:[%s597_s1 + $0x4] sm:$0xf] }
   0xd   :  { %v330_v19 = vld [vmem:[%s597_s1 + $0x8] sm:$0xf0]  ;;  %v329_v20 = vor.u32 %v403_v17, %v328_v16  ;;  %v241_v25 = vmul.u32 128, %v233_v23  ;;  %v234_v29 = vadd.s32 8, %v233_v23  ;;  %v425_v42 = vld [vmem:[%s599_s3] ss:$0 sm:$0xff] }
   0xe   :  { %167 = vmatpush.bf16.msra.mxu0 %v408_v6  ;;  %v333_v21 = vor.u32 %v402_v18, %v330_v19  ;;  %s487_s3 = smov [#allocation4]   ;;  %s490_s19 = smov 8  }
   0xf   :  { %181 = vmatpush.bf16.msra.mxu1 %v416_v7  ;;  %v243_v26 = vadd.s32 %v241_v25, %v240_v24  ;;  %v242_v30 = vmul.u32 128, %v234_v29  ;;  %v486_v29 = vmov 0.0   ;;  %s587_s10 = sshll.u32 %s487_s3, 4  ;;  %s295_s10 = int_to_ptr.vmem [resolvable:$true] %s587_s10 }
  0x11   :  { %v248_v28 = vadd.s32 %v247_v27, %v243_v26  ;;  %v244_v32 = vadd.s32 %v242_v30, %v240_v24 }
  0x12   :  { %168 = vmatpush.bf16.msra.mxu0 %v407_v8 }
  0x13   :  { %182 = vmatpush.bf16.msra.mxu1 %v415_v9  ;;  %v250_v31 = vshrl.u32 %v248_v28, 16  ;;  %v249_v34 = vadd.s32 %v247_v27, %v244_v32 }
  0x15   :  { %v252_v33 = vxor.u32 %v250_v31, %v248_v28  ;;  %v251_v36 = vshrl.u32 %v249_v34, 16 }
  0x16   :  { %169 = vmatpush.bf16.msra.mxu0 %v406_v10 }
  0x17   :  { %183 = vmatpush.bf16.msra.mxu1 %v414_v11  ;;  %v254_v35 = vmul.u32 2146121005, %v252_v33  ;;  %v253_v38 = vxor.u32 %v251_v36, %v249_v34 }
  0x19   :  { %v256_v37 = vshrl.u32 %v254_v35, 15  ;;  %v255_v40 = vmul.u32 2146121005, %v253_v38 }
  0x1a   :  { %170 = vmatpush.bf16.msra.mxu0 %v405_v12 }
  0x1b   :  { %184 = vmatpush.bf16.msra.mxu1 %v413_v13  ;;  %v258_v39 = vxor.u32 %v256_v37, %v254_v35  ;;  %v257_v43 = vshrl.u32 %v255_v40, 15 }
  0x1d   :  { %v260_v41 = vmul.u32 2221713035, %v258_v39  ;;  %v259_v48 = vxor.u32 %v257_v43, %v255_v40 }
  0x1e   :  { %171 = vmatpush.bf16.msra.mxu0 %v404_v14 }
  0x1f   :  { %185 = vmatpush.bf16.msra.mxu1 %v412_v15  ;;  %v262_v46 = vshrl.u32 %v260_v41, 16  ;;  %v261_v52 = vmul.u32 2221713035, %v259_v48 }
  0x21   :  { %172 = vmatmul.bf16.vlgmr.msra.gmra.mxu0 %v329_v20  ;;  %v264_v50 = vxor.u32 %v262_v46, %v260_v41  ;;  %v263_v56 = vshrl.u32 %v261_v52, 16 }
  0x22   :  { %186 = vmatmul.bf16.vlgmr.msra.gmra.mxu1 %v333_v21 }
  0x23   :  { %v266_v54 = vshrl.u32 %v264_v50, 8  ;;  %v265_v62 = vxor.u32 %v263_v56, %v261_v52 }
  0x25   :  { %v268_v59 = vshrl.u32 %v266_v54, 16  ;;  %v269_v0 = vand.u32 65535, %v266_v54  ;;  %v267_v2 = vshrl.u32 %v265_v62, 8 }
  0x27   :  { %v270_v1 = vcvt.s32.f32 %v268_v59  ;;  %v272_v4 = vcvt.s32.f32 %v269_v0  ;;  %v274_v6 = vshrl.u32 %v267_v2, 16  ;;  %v275_v12 = vand.u32 65535, %v267_v2 }
  0x29   :  { %v271_v3 = vmul.f32 65536.0, %v270_v1  ;;  %v276_v13 = vcvt.s32.f32 %v274_v6  ;;  %v278_v20 = vcvt.s32.f32 %v275_v12 }
  0x2b   :  { %v273_v10 = vadd.f32 %v272_v4, %v271_v3  ;;  %v277_v19 = vmul.f32 65536.0, %v276_v13 }
  0x2d   :  { %v280_v17 = vmul.f32 5.9604645e-08, %v273_v10  ;;  %v279_v27 = vadd.f32 %v278_v20, %v277_v19 }
  0x2f   :  { %v281_v34 = vmul.f32 5.9604645e-08, %v279_v27 }
  0x9e   :  { %v173_v44 = vpop.f32.mrf.mxu0 }
  0x9f   :  { %v187_v45 = vpop.f32.mrf.mxu1  ;;  %v174_v47 = vadd.f32 %v425_v42, %v173_v44 }
  0xa1   :  { %v188_v49 = vadd.f32 %v187_v45, %v174_v47 }
  0xa3   :  { %v398_v51 = vmul.f32 -1.442695, %v188_v49 }
  0xa5   :  { %426 = vpow2.f32 %v398_v51 }
  0xa6   :  { %v175_v53 = vpop.f32.mrf.mxu0 }
  0xa7   :  { %v176_v55 = vadd.f32 %v425_v42, %v175_v53  ;;  %v189_v57 = vpop.f32.mrf.mxu1 }
  0xa9   :  { %v190_v58 = vadd.f32 %v189_v57, %v176_v55 }
  0xab   :  { %v427_v60 = vpop.eup %426  ;;  %v399_v61 = vmul.f32 -1.442695, %v190_v58 }
  0xac   :  { %v198_v63 = vadd.f32 1.0, %v427_v60 }
  0xad   :  { %428 = vpow2.f32 %v399_v61 }
  0xae   :  { %430 = vrcp.f32 %v198_v63  ;;  %v211_v14 = vand.u32 2147483648, %v198_v63  ;;  %v209_v16 = vand.u32 2147483647, %v198_v63  ;;  %vm205_vm1 = vweird.f32 %v198_v63 }
  0xb0   :  { %v212_v22 = vor.u32 1.1754944e-38, %v211_v14  ;;  %vm210_vm3 = vcmp.eq.f32.partialorder %v209_v16, 8.507059e+37 }
  0xb3   :  { %v429_v5 = vpop.eup %428 }
  0xb4   :  { %v431_v7 = vpop.eup %430  ;;  %v199_v8 = vadd.f32 1.0, %v429_v5 }
  0xb5   :  { %v201_v9 = vmul.f32 %v431_v7, %v198_v63  ;;  %vm206_vm0 = vweird.f32 %v431_v7 }
  0xb6   :  { %432 = vrcp.f32 %v199_v8  ;;  %vm207_vm2 = vmor %vm205_vm1, %vm206_vm0  ;;  %v226_v28 = vand.u32 2147483648, %v199_v8  ;;  %v224_v32 = vand.u32 2147483647, %v199_v8  ;;  %vm220_vm6 = vweird.f32 %v199_v8 }
  0xb7   :  { %v202_v11 = vsub.f32 1.0, %v201_v9 }
  0xb8   :  { %v227_v35 = vor.u32 1.1754944e-38, %v226_v28  ;;  %vm225_vm8 = vcmp.eq.f32.partialorder %v224_v32, 8.507059e+37 }
  0xb9   :  { %v203_v15 = vmul.f32 %v431_v7, %v202_v11 }
  0xbb   :  { %v204_v18 = vadd.f32 %v431_v7, %v203_v15 }
  0xbc   :  { %v433_v21 = vpop.eup %432 }
  0xbd   :  { %v216_v23 = vmul.f32 %v433_v21, %v199_v8  ;;  %v208_v24 = vsel %vm207_vm2, %v431_v7, %v204_v18  ;;  %vm221_vm5 = vweird.f32 %v433_v21 }
  0xbe   :  { %v213_v25 = vsel %vm210_vm3, %v212_v22, %v208_v24  ;;  %vm222_vm7 = vmor %vm220_vm6, %vm221_vm5 }
  0xbf   :  { %v217_v26 = vsub.f32 1.0, %v216_v23  ;;  %230 = vst [vmem:[#allocation4] sm:$0xff] %v213_v25  ;;  %vm282_vm4 = vcmp.lt.f32.partialorder %v280_v17, %v213_v25 }
  0xc0   :  { %v400_v30 = vsel %vm282_vm4, 1.0, %v486_v29 }
  0xc1   :  { %v218_v31 = vmul.f32 %v433_v21, %v217_v26  ;;  %288 = vst [vmem:[#allocation6] sm:$0xff] %v400_v30 }
  0xc3   :  { %v219_v33 = vadd.f32 %v433_v21, %v218_v31 }
  0xc5   :  { %v223_v36 = vsel %vm222_vm7, %v433_v21, %v219_v33 }
  0xc6   :  { %v228_v37 = vsel %vm225_vm8, %v227_v35, %v223_v36 }
  0xc7   :  { %231 = vst [vmem:[#allocation4 + $0x8] sm:$0xff] %v228_v37  ;;  %vm283_vm9 = vcmp.lt.f32.partialorder %v281_v34, %v228_v37 }
  0xc8   :  { %v401_v38 = vsel %vm283_vm9, 1.0, %v486_v29  ;;  %302 = dma.vmem_to_hbm [thread:$0]  %s295_s10, 256, %s297_s13, [#allocation5], %s489_s4, %s489_s4, %s490_s19  }
  0xc9   :  { %289 = vst [vmem:[#allocation6 + $0x8] sm:$0xff] %v401_v38 }
  0xca   :  { %315 = dma.vmem_to_hbm [thread:$0]  %s308_s15, 256, %s310_s18, [#allocation7], %s489_s4, %s489_s4, %s490_s19  }
  0xcb   :  { %482 = dma.done.wait [#allocation5], 256  }
  0xcc   :  { %483 = vsyncadd [#allocation5], 4294967040 }
  0xcd   :  { %484 = dma.done.wait [#allocation7], 256  }
  0xce   :  { %485 = vsyncadd [#allocation7], 4294967040 }
  0xcf   :  { %324 = vsyncpa [#allocation5], 1 }
  0xd0   :  { %325 = vsyncpa [#allocation7], 1 }

</bundles_post_ra>
